<compile_context>
chip_gen: v7x
topology: tpu7x:2x2x1
jax: 0.10.0
libtpu: 0.0.40
codegen_flags: <defaults>
</compile_context>

<pallas_src>
import functools
import math

import numpy as np
import jax
import jax.numpy as jnp
from jax.experimental import pallas as pl
from jax.experimental.pallas import tpu as pltpu

LANE = 128
NEG_INF = -1e30


def _round_up(x, m):
    return ((x + m - 1) // m) * m


def _pick_tile(T):
    # Prefer 256-multiples (full-width v6e/v7x MXU); fall back to smaller
    # divisors of T; worst case use T itself (full-dim block exception).
    for t in (512, 256, 128, 64, 32, 16, 8):
        if T >= t and T % t == 0:
            return t
    return T


def _mha_flash_kernel(x_q_ref, x_kv_ref, wq_ref, wk_ref, wv_ref,
                      pos_q_ref, pos_kv_ref, mask_ref, wproj_ref, bproj_ref,
                      o_ref, q_s, m_s, l_s, acc_s, *, scale):
    qi = pl.program_id(1)
    kv = pl.program_id(2)

    bb, tq, d_in = x_q_ref.shape
    tk = x_kv_ref.shape[1]
    dp = wq_ref.shape[1]
    d_out = o_ref.shape[-1]

    @pl.when(kv == 0)
    def _init():
        # Project Q once per (batch-block, q-tile) and add positional encodings.
        xq = x_q_ref[...].reshape(bb * tq, d_in)
        q = jnp.dot(xq, wq_ref[...], preferred_element_type=jnp.float32)
        q = q.reshape(bb, tq, dp) + pos_q_ref[...][None]
        q_s[...] = q.astype(jnp.bfloat16)
        m_s[...] = jnp.full(m_s.shape, -jnp.inf, jnp.float32)
        l_s[...] = jnp.zeros(l_s.shape, jnp.float32)
        acc_s[...] = jnp.zeros(acc_s.shape, jnp.float32)

    # Causal tile skip: kv tiles strictly above the diagonal contribute nothing
    # (their x/pos/mask index_maps are clamped, so even the DMAs are elided).
    @pl.when(kv <= qi)
    def _compute():
        xkv = x_kv_ref[...].reshape(bb * tk, d_in)
        k = jnp.dot(xkv, wk_ref[...], preferred_element_type=jnp.float32)
        k = (k.reshape(bb, tk, dp) + pos_kv_ref[...][None]).astype(jnp.bfloat16)
        v = jnp.dot(xkv, wv_ref[...], preferred_element_type=jnp.float32)
        v = v.reshape(bb, tk, dp).astype(jnp.bfloat16)

        # Scores: contract last axes (no explicit K transpose); f32 accumulate.
        s = jnp.einsum("bqd,bkd->bqk", q_s[...], k,
                       preferred_element_type=jnp.float32) * scale
        # Batch-invariant additive causal mask: all-zeros block below the
        # diagonal, 0/-1e30 lower-triangular block on the diagonal tile.
        s = s + mask_ref[...]

        # Online softmax update.
        m_new = jnp.maximum(m_s[...], jnp.max(s, axis=-1, keepdims=True))
        alpha = jnp.exp(m_s[...] - m_new)
        p = jnp.exp(s - m_new)
        l_s[...] = alpha * l_s[...] + jnp.sum(p, axis=-1, keepdims=True)
        acc_s[...] = alpha * acc_s[...] + jnp.einsum(
            "bqk,bkd->bqd", p.astype(jnp.bfloat16), v,
            preferred_element_type=jnp.float32)
        m_s[...] = m_new

    # The last contributing kv tile for q-tile `qi` is kv == qi: finalize there
    # (output block stays VMEM-resident across the remaining skipped kv steps).
    @pl.when(kv == qi)
    def _finalize():
        ctx = acc_s[...] * pl.reciprocal(l_s[...], approx=True)
        ctx2d = ctx.reshape(bb * tq, dp).astype(jnp.bfloat16)
        out = jnp.dot(ctx2d, wproj_ref[...],
                      preferred_element_type=jnp.float32) + bproj_ref[...]
        o_ref[...] = out.reshape(bb, tq, d_out)


def mha_sdpa_pallas(x, w_qkv, pos_enc, w_proj, b_proj, *, num_heads=1,
                    batch_block=None, tile=None):
    """x: (B, T, d_in) f32. w_qkv: (3*d_out, d_in). w_proj: (d_out, d_in). b_proj: (d_out,)."""
    B, T, d_in = x.shape
    d_out = w_proj.shape[0]
    assert num_heads == 1, "pos-enc broadcast in the module needs head_dim == d_out"
    assert d_in == d_out, "module's proj = nn.Linear(d_in, d_out) applied to d_out-wide context"
    head_dim = d_out // num_heads
    scale = 1.0 / math.sqrt(head_dim)

    dp = _round_up(d_out, LANE)                 # lane-dense Q/K/V width (VMEM-only padding)

    bb = 1 if batch_block is None else batch_block   # >=2 grid steps on batch by default
    assert B % bb == 0

    tq = tk = _pick_tile(T) if tile is None else tile
    assert T % tq == 0
    assert bb == 1 or tq % 8 == 0, "reshape (bb,tq,d)->(bb*tq,d) needs sublane-aligned tq"
    nq = T // tq
    nkv = T // tk

    # --- wrapper-side prep (cheap, layout plumbing only; x stays unpadded) ---
    x_bf = x.astype(jnp.bfloat16)

    w_qkv_t = jnp.transpose(w_qkv)              # (d_in, 3*d_out)

    def _pad_w(w):                              # (d_in, d_out) -> (d_in, dp) bf16
        return (jnp.zeros((d_in, dp), jnp.float32).at[:, :d_out].set(w)
                .astype(jnp.bfloat16))

    wq_p = _pad_w(w_qkv_t[:, 0:d_out])
    wk_p = _pad_w(w_qkv_t[:, d_out:2 * d_out])
    wv_p = _pad_w(w_qkv_t[:, 2 * d_out:3 * d_out])

    wproj_p = (jnp.zeros((dp, d_out), jnp.float32)
               .at[:d_out, :].set(jnp.transpose(w_proj))).astype(jnp.bfloat16)
    bproj_p = b_proj.reshape(1, d_out).astype(jnp.float32)
    pos_p = jnp.zeros((T, dp), jnp.float32).at[:, :d_out].set(pos_enc)

    # Additive causal mask tiles: block 0 = all zeros (below-diagonal tiles),
    # block 1 = lower-triangular 0 / -1e30 (diagonal tile).  Requires tq == tk.
    rr = np.arange(tq)[:, None]
    cc = np.arange(tk)[None, :]
    diag = np.where(cc <= rr, 0.0, NEG_INF).astype(np.float32)
    mask = jnp.asarray(np.stack([np.zeros((tq, tk), np.float32), diag]))

    grid = (B // bb, nq, nkv)

    out = pl.pallas_call(
        functools.partial(_mha_flash_kernel, scale=scale),
        out_shape=jax.ShapeDtypeStruct((B, T, d_out), jnp.float32),
        grid=grid,
        in_specs=[
            # x rows for this q tile (unpadded last dim).
            pl.BlockSpec((bb, tq, d_in), lambda b, qi, kv: (b, qi, 0)),
            # x rows for this kv tile; clamp above-diagonal tiles to the diag
            # tile so their DMAs are skipped (block index unchanged).
            pl.BlockSpec((bb, tk, d_in),
                         lambda b, qi, kv: (b, jnp.minimum(kv, qi), 0)),
            pl.BlockSpec((d_in, dp), lambda b, qi, kv: (0, 0)),   # Wq
            pl.BlockSpec((d_in, dp), lambda b, qi, kv: (0, 0)),   # Wk
            pl.BlockSpec((d_in, dp), lambda b, qi, kv: (0, 0)),   # Wv
            pl.BlockSpec((tq, dp), lambda b, qi, kv: (qi, 0)),    # pos (q rows)
            pl.BlockSpec((tk, dp),
                         lambda b, qi, kv: (jnp.minimum(kv, qi), 0)),  # pos (kv rows)
            # Mask tile: zeros below diagonal, triangular on/above (above is skipped).
            pl.BlockSpec((1, tq, tk),
                         lambda b, qi, kv: (jnp.where(kv >= qi, 1, 0), 0, 0)),
            pl.BlockSpec((dp, d_out), lambda b, qi, kv: (0, 0)),  # W_proj^T (padded rows)
            pl.BlockSpec((1, d_out), lambda b, qi, kv: (0, 0)),   # b_proj
        ],
        out_specs=pl.BlockSpec((bb, tq, d_out), lambda b, qi, kv: (b, qi, 0)),
        scratch_shapes=[
            pltpu.VMEM((bb, tq, dp), jnp.bfloat16),   # projected Q tile
            pltpu.VMEM((bb, tq, 1), jnp.float32),     # running max
            pltpu.VMEM((bb, tq, 1), jnp.float32),     # running denominator
            pltpu.VMEM((bb, tq, dp), jnp.float32),    # running context accumulator
        ],
        compiler_params=pltpu.CompilerParams(
            dimension_semantics=("parallel", "parallel", "arbitrary"),
            vmem_limit_bytes=48 * 1024 * 1024),
    )(x_bf, x_bf, wq_p, wk_p, wv_p, pos_p, pos_p, mask, wproj_p, bproj_p)

    return out


def positional_encodings(length, embed_dim):
    """Same table as PositionalEncoder.__init__ (sin on even cols, cos on odd cols)."""
    pos = np.arange(length, dtype=np.float32)
    inv_freq = 1.0 / (10000.0 ** (np.arange(0.0, embed_dim, 2.0, dtype=np.float32) / embed_dim))
    enc = np.zeros((length, embed_dim), dtype=np.float32)
    enc[:, 0::2] = np.sin(pos[:, None] * inv_freq)
    enc[:, 1::2] = np.cos(pos[:, None] * inv_freq)
    return jnp.asarray(enc)


def init_linear(key, fan_in, fan_out, bias=True):
    """Deterministic stand-in for nn.Linear default init (uniform(-1/sqrt(fan_in), ..))."""
    kw, kb = jax.random.split(key)
    bound = 1.0 / np.sqrt(fan_in)
    w = jax.random.uniform(kw, (fan_out, fan_in), jnp.float32, -bound, bound)
    b = jax.random.uniform(kb, (fan_out,), jnp.float32, -bound, bound) if bias else None
    return w, b


def reference_jax(x, w_qkv, pos_enc, w_proj, b_proj):
    """Pure-JAX f32 reference with identical math (eval mode, dropout=0, num_heads=1)."""
    B, T, d_in = x.shape
    d_out = w_proj.shape[0]
    qkv = x @ jnp.transpose(w_qkv)                                  # (B, T, 3*d_out)
    q, k, v = qkv[..., :d_out], qkv[..., d_out:2 * d_out], qkv[..., 2 * d_out:]
    q = q + pos_enc[None]
    k = k + pos_enc[None]
    s = jnp.einsum("btd,bsd->bts", q, k) / np.sqrt(d_out)
    mask = np.tril(np.ones((T, T), dtype=bool))
    s = jnp.where(mask[None], s, NEG_INF)
    p = jax.nn.softmax(s, axis=-1)
    ctx = jnp.einsum("bts,bsd->btd", p, v)
    return ctx @ jnp.transpose(w_proj) + b_proj[None, None, :]


if __name__ == "__main__":
    # Small config consistent with the module: d_in == d_out (required by self.proj),
    # num_heads == 1 (required by the positional-encoding broadcast in forward()).
    B, T = 2, 8
    d_in = d_out = 32
    num_heads = 1

    key = jax.random.PRNGKey(0)
    kx, kqkv, kproj = jax.random.split(key, 3)

    x = jax.random.normal(kx, (B, T, d_in), dtype=jnp.float32)

    # qkv = nn.Linear(d_in, 3*d_out, bias=False); proj = nn.Linear(d_in, d_out)
    w_qkv, _ = init_linear(kqkv, d_in, 3 * d_out, bias=False)
    w_proj, b_proj = init_linear(kproj, d_in, d_out, bias=True)

    pos_enc = positional_encodings(T, d_out)

    out = mha_sdpa_pallas(x, w_qkv, pos_enc, w_proj, b_proj, num_heads=num_heads)
    out = jax.block_until_ready(out)

    ref = jax.block_until_ready(reference_jax(x, w_qkv, pos_enc, w_proj, b_proj))
    assert out.shape == (B, T, d_out)
    # bf16 MXU operands + bf16 probabilities + approx reciprocal -> loosened tolerance.
    assert np.allclose(np.asarray(out), np.asarray(ref), rtol=2e-2, atol=2e-2)

    print("KERNEL_OK")
</pallas_src>

<mosaic_0001>
module attributes {stable_mosaic.version = 11 : i64} {
  func.func @_mha_flash_kernel(%arg0: i32, %arg1: i32, %arg2: i32, %arg3: memref<1x8x32xbf16, #tpu.memory_space<vmem>>, %arg4: memref<1x8x32xbf16, #tpu.memory_space<vmem>>, %arg5: memref<32x128xbf16, #tpu.memory_space<vmem>>, %arg6: memref<32x128xbf16, #tpu.memory_space<vmem>>, %arg7: memref<32x128xbf16, #tpu.memory_space<vmem>>, %arg8: memref<8x128xf32, #tpu.memory_space<vmem>>, %arg9: memref<8x128xf32, #tpu.memory_space<vmem>>, %arg10: memref<1x8x8xf32, #tpu.memory_space<vmem>>, %arg11: memref<128x32xbf16, #tpu.memory_space<vmem>>, %arg12: memref<1x32xf32, #tpu.memory_space<vmem>>, %arg13: memref<1x8x32xf32, #tpu.memory_space<vmem>>, %arg14: memref<1x8x128xbf16, #tpu.memory_space<vmem>>, %arg15: memref<1x8x1xf32, #tpu.memory_space<vmem>>, %arg16: memref<1x8x1xf32, #tpu.memory_space<vmem>>, %arg17: memref<1x8x128xf32, #tpu.memory_space<vmem>>) attributes {dimension_semantics = [#tpu.dimension_semantics<parallel>, #tpu.dimension_semantics<parallel>, #tpu.dimension_semantics<arbitrary>], iteration_bounds = array<i64: 2, 1, 1>, scalar_prefetch = 0 : i64, scratch_operands = 4 : i64, tpu.core_type = #tpu.core_type<tc>, window_params = [{transform_indices = @transform_0, window_bounds = array<i64: 1, 8, 32>}, {transform_indices = @transform_1, window_bounds = array<i64: 1, 8, 32>}, {pipeline_mode = #tpu.pipeline_mode<synchronous>, transform_indices = @transform_2, window_bounds = array<i64: 32, 128>}, {pipeline_mode = #tpu.pipeline_mode<synchronous>, transform_indices = @transform_3, window_bounds = array<i64: 32, 128>}, {pipeline_mode = #tpu.pipeline_mode<synchronous>, transform_indices = @transform_4, window_bounds = array<i64: 32, 128>}, {transform_indices = @transform_5, window_bounds = array<i64: 8, 128>}, {transform_indices = @transform_6, window_bounds = array<i64: 8, 128>}, {transform_indices = @transform_7, window_bounds = array<i64: 1, 8, 8>}, {pipeline_mode = #tpu.pipeline_mode<synchronous>, transform_indices = @transform_8, window_bounds = array<i64: 128, 32>}, {pipeline_mode = #tpu.pipeline_mode<synchronous>, transform_indices = @transform_9, window_bounds = array<i64: 1, 32>}, {transform_indices = @transform_10, window_bounds = array<i64: 1, 8, 32>}]} {
    %c0_i32 = arith.constant 0 : i32
    %0 = arith.cmpi eq, %arg2, %c0_i32 : i32
    %1 = arith.extui %0 : i1 to i32
    %c0_i32_0 = arith.constant 0 : i32
    %2 = arith.cmpi ne, %1, %c0_i32_0 : i32
    scf.if %2 {
      %c0 = arith.constant 0 : index
      %c0_3 = arith.constant 0 : index
      %c0_4 = arith.constant 0 : index
      %9 = vector.load %arg3[%c0, %c0_3, %c0_4] : memref<1x8x32xbf16, #tpu.memory_space<vmem>>, vector<1x8x32xbf16>
      %10 = vector.shape_cast %9 : vector<1x8x32xbf16> to vector<8x32xbf16>
      %c0_5 = arith.constant 0 : index
      %c0_6 = arith.constant 0 : index
      %11 = vector.load %arg5[%c0_5, %c0_6] : memref<32x128xbf16, #tpu.memory_space<vmem>>, vector<32x128xbf16>
      %cst = arith.constant dense<0.000000e+00> : vector<8x128xf32>
      %12 = tpu.matmul %10, %11, %cst {dimension_numbers = #tpu.dot_dimension_numbers<[1], [0], [0], [1], [0, 0, 1, 1], [], []>} : vector<8x32xbf16>, vector<32x128xbf16>, vector<8x128xf32> -> vector<8x128xf32>
      %13 = vector.shape_cast %12 : vector<8x128xf32> to vector<1x8x128xf32>
      %c0_7 = arith.constant 0 : index
      %c0_8 = arith.constant 0 : index
      %14 = vector.load %arg8[%c0_7, %c0_8] : memref<8x128xf32, #tpu.memory_space<vmem>>, vector<8x128xf32>
      %15 = vector.shape_cast %14 : vector<8x128xf32> to vector<1x8x128xf32>
      %16 = arith.addf %13, %15 : vector<1x8x128xf32>
      %17 = arith.truncf %16 : vector<1x8x128xf32> to vector<1x8x128xbf16>
      %c0_9 = arith.constant 0 : index
      %c0_10 = arith.constant 0 : index
      %c0_11 = arith.constant 0 : index
      %18 = vector.load %arg14[%c0_9, %c0_10, %c0_11] : memref<1x8x128xbf16, #tpu.memory_space<vmem>>, vector<1x8x128xbf16>
      tpu.vector_store %arg14[%c0_9, %c0_10, %c0_11], %17 {strides = array<i32>} : memref<1x8x128xbf16, #tpu.memory_space<vmem>>, vector<1x8x128xbf16>,
      %cst_12 = arith.constant 0xFF800000 : f32
      %19 = vector.broadcast %cst_12 : f32 to vector<1x8x1xf32>
      %c0_13 = arith.constant 0 : index
      %c0_14 = arith.constant 0 : index
      %c0_15 = arith.constant 0 : index
      %20 = vector.load %arg15[%c0_13, %c0_14, %c0_15] : memref<1x8x1xf32, #tpu.memory_space<vmem>>, vector<1x8x1xf32>
      tpu.vector_store %arg15[%c0_13, %c0_14, %c0_15], %19 {strides = array<i32>} : memref<1x8x1xf32, #tpu.memory_space<vmem>>, vector<1x8x1xf32>,
      %cst_16 = arith.constant 0.000000e+00 : f32
      %21 = vector.broadcast %cst_16 : f32 to vector<1x8x1xf32>
      %c0_17 = arith.constant 0 : index
      %c0_18 = arith.constant 0 : index
      %c0_19 = arith.constant 0 : index
      %22 = vector.load %arg16[%c0_17, %c0_18, %c0_19] : memref<1x8x1xf32, #tpu.memory_space<vmem>>, vector<1x8x1xf32>
      tpu.vector_store %arg16[%c0_17, %c0_18, %c0_19], %21 {strides = array<i32>} : memref<1x8x1xf32, #tpu.memory_space<vmem>>, vector<1x8x1xf32>,
      %cst_20 = arith.constant 0.000000e+00 : f32
      %23 = vector.broadcast %cst_20 : f32 to vector<1x8x128xf32>
      %c0_21 = arith.constant 0 : index
      %c0_22 = arith.constant 0 : index
      %c0_23 = arith.constant 0 : index
      %24 = vector.load %arg17[%c0_21, %c0_22, %c0_23] : memref<1x8x128xf32, #tpu.memory_space<vmem>>, vector<1x8x128xf32>
      tpu.vector_store %arg17[%c0_21, %c0_22, %c0_23], %23 {strides = array<i32>} : memref<1x8x128xf32, #tpu.memory_space<vmem>>, vector<1x8x128xf32>,
    } else {
    }
    %3 = arith.cmpi sle, %arg2, %arg1 : i32
    %4 = arith.extui %3 : i1 to i32
    %c0_i32_1 = arith.constant 0 : i32
    %5 = arith.cmpi ne, %4, %c0_i32_1 : i32
    scf.if %5 {
      %c0 = arith.constant 0 : index
      %c0_3 = arith.constant 0 : index
      %c0_4 = arith.constant 0 : index
      %9 = vector.load %arg4[%c0, %c0_3, %c0_4] : memref<1x8x32xbf16, #tpu.memory_space<vmem>>, vector<1x8x32xbf16>
      %10 = vector.shape_cast %9 : vector<1x8x32xbf16> to vector<8x32xbf16>
      %c0_5 = arith.constant 0 : index
      %c0_6 = arith.constant 0 : index
      %11 = vector.load %arg6[%c0_5, %c0_6] : memref<32x128xbf16, #tpu.memory_space<vmem>>, vector<32x128xbf16>
      %cst = arith.constant dense<0.000000e+00> : vector<8x128xf32>
      %12 = tpu.matmul %10, %11, %cst {dimension_numbers = #tpu.dot_dimension_numbers<[1], [0], [0], [1], [0, 0, 1, 1], [], []>} : vector<8x32xbf16>, vector<32x128xbf16>, vector<8x128xf32> -> vector<8x128xf32>
      %13 = vector.shape_cast %12 : vector<8x128xf32> to vector<1x8x128xf32>
      %c0_7 = arith.constant 0 : index
      %c0_8 = arith.constant 0 : index
      %14 = vector.load %arg9[%c0_7, %c0_8] : memref<8x128xf32, #tpu.memory_space<vmem>>, vector<8x128xf32>
      %15 = vector.shape_cast %14 : vector<8x128xf32> to vector<1x8x128xf32>
      %16 = arith.addf %13, %15 : vector<1x8x128xf32>
      %17 = arith.truncf %16 : vector<1x8x128xf32> to vector<1x8x128xbf16>
      %c0_9 = arith.constant 0 : index
      %c0_10 = arith.constant 0 : index
      %18 = vector.load %arg7[%c0_9, %c0_10] : memref<32x128xbf16, #tpu.memory_space<vmem>>, vector<32x128xbf16>
      %cst_11 = arith.constant dense<0.000000e+00> : vector<8x128xf32>
      %19 = tpu.matmul %10, %18, %cst_11 {dimension_numbers = #tpu.dot_dimension_numbers<[1], [0], [0], [1], [0, 0, 1, 1], [], []>} : vector<8x32xbf16>, vector<32x128xbf16>, vector<8x128xf32> -> vector<8x128xf32>
      %20 = vector.shape_cast %19 : vector<8x128xf32> to vector<1x8x128xf32>
      %21 = arith.truncf %20 : vector<1x8x128xf32> to vector<1x8x128xbf16>
      %c0_12 = arith.constant 0 : index
      %c0_13 = arith.constant 0 : index
      %c0_14 = arith.constant 0 : index
      %22 = vector.load %arg14[%c0_12, %c0_13, %c0_14] : memref<1x8x128xbf16, #tpu.memory_space<vmem>>, vector<1x8x128xbf16>
      "tpu.trace_start"() <{level = 10 : i32, message = "bqd,bkd->bqk"}> : () -> ()
      %cst_15 = arith.constant dense<0.000000e+00> : vector<1x8x8xf32>
      %23 = tpu.matmul %22, %17, %cst_15 {dimension_numbers = #tpu.dot_dimension_numbers<[2], [2], [1], [1], [0, 0, 0, 1, 1, 1], [0], [0]>} : vector<1x8x128xbf16>, vector<1x8x128xbf16>, vector<1x8x8xf32> -> vector<1x8x8xf32>
      "tpu.trace_stop"() : () -> ()
      %cst_16 = arith.constant 0.176776692 : f32
      %24 = vector.broadcast %cst_16 : f32 to vector<1x8x8xf32>
      %25 = arith.mulf %23, %24 : vector<1x8x8xf32>
      %c0_17 = arith.constant 0 : index
      %c0_18 = arith.constant 0 : index
      %c0_19 = arith.constant 0 : index
      %26 = vector.load %arg10[%c0_17, %c0_18, %c0_19] : memref<1x8x8xf32, #tpu.memory_space<vmem>>, vector<1x8x8xf32>
      %27 = arith.addf %25, %26 : vector<1x8x8xf32>
      %c0_20 = arith.constant 0 : index
      %c0_21 = arith.constant 0 : index
      %c0_22 = arith.constant 0 : index
      %28 = vector.load %arg15[%c0_20, %c0_21, %c0_22] : memref<1x8x1xf32, #tpu.memory_space<vmem>>, vector<1x8x1xf32>
      %cst_23 = arith.constant dense<0xFF800000> : vector<1x8xf32>
      %29 = vector.multi_reduction <maximumf>, %27, %cst_23 [2] : vector<1x8x8xf32> to vector<1x8xf32>
      %30 = vector.shape_cast %29 : vector<1x8xf32> to vector<1x8x1xf32>
      %31 = arith.maximumf %28, %30 : vector<1x8x1xf32>
      %c0_24 = arith.constant 0 : index
      %c0_25 = arith.constant 0 : index
      %c0_26 = arith.constant 0 : index
      %32 = vector.load %arg15[%c0_24, %c0_25, %c0_26] : memref<1x8x1xf32, #tpu.memory_space<vmem>>, vector<1x8x1xf32>
      %33 = arith.subf %32, %31 : vector<1x8x1xf32>
      %34 = math.exp %33 : vector<1x8x1xf32>
      %35 = vector.broadcast %31 : vector<1x8x1xf32> to vector<1x8x8xf32>
      %36 = arith.subf %27, %35 : vector<1x8x8xf32>
      %37 = math.exp %36 : vector<1x8x8xf32>
      %c0_27 = arith.constant 0 : index
      %c0_28 = arith.constant 0 : index
      %c0_29 = arith.constant 0 : index
      %38 = vector.load %arg16[%c0_27, %c0_28, %c0_29] : memref<1x8x1xf32, #tpu.memory_space<vmem>>, vector<1x8x1xf32>
      %39 = arith.mulf %34, %38 : vector<1x8x1xf32>
      %cst_30 = arith.constant dense<0.000000e+00> : vector<1x8xf32>
      %40 = vector.multi_reduction <add>, %37, %cst_30 [2] : vector<1x8x8xf32> to vector<1x8xf32>
      %41 = vector.shape_cast %40 : vector<1x8xf32> to vector<1x8x1xf32>
      %42 = arith.addf %39, %41 : vector<1x8x1xf32>
      %c0_31 = arith.constant 0 : index
      %c0_32 = arith.constant 0 : index
      %c0_33 = arith.constant 0 : index
      %43 = vector.load %arg16[%c0_31, %c0_32, %c0_33] : memref<1x8x1xf32, #tpu.memory_space<vmem>>, vector<1x8x1xf32>
      tpu.vector_store %arg16[%c0_31, %c0_32, %c0_33], %42 {strides = array<i32>} : memref<1x8x1xf32, #tpu.memory_space<vmem>>, vector<1x8x1xf32>,
      %c0_34 = arith.constant 0 : index
      %c0_35 = arith.constant 0 : index
      %c0_36 = arith.constant 0 : index
      %44 = vector.load %arg17[%c0_34, %c0_35, %c0_36] : memref<1x8x128xf32, #tpu.memory_space<vmem>>, vector<1x8x128xf32>
      %45 = vector.broadcast %34 : vector<1x8x1xf32> to vector<1x8x128xf32>
      %46 = arith.mulf %45, %44 : vector<1x8x128xf32>
      %47 = arith.truncf %37 : vector<1x8x8xf32> to vector<1x8x8xbf16>
      "tpu.trace_start"() <{level = 10 : i32, message = "bqk,bkd->bqd"}> : () -> ()
      %cst_37 = arith.constant dense<0.000000e+00> : vector<1x8x128xf32>
      %48 = tpu.matmul %47, %21, %cst_37 {dimension_numbers = #tpu.dot_dimension_numbers<[2], [1], [1], [2], [0, 0, 0, 1, 1, 2], [0], [0]>} : vector<1x8x8xbf16>, vector<1x8x128xbf16>, vector<1x8x128xf32> -> vector<1x8x128xf32>
      "tpu.trace_stop"() : () -> ()
      %49 = arith.addf %46, %48 : vector<1x8x128xf32>
      %c0_38 = arith.constant 0 : index
      %c0_39 = arith.constant 0 : index
      %c0_40 = arith.constant 0 : index
      %50 = vector.load %arg17[%c0_38, %c0_39, %c0_40] : memref<1x8x128xf32, #tpu.memory_space<vmem>>, vector<1x8x128xf32>
      tpu.vector_store %arg17[%c0_38, %c0_39, %c0_40], %49 {strides = array<i32>} : memref<1x8x128xf32, #tpu.memory_space<vmem>>, vector<1x8x128xf32>,
      %c0_41 = arith.constant 0 : index
      %c0_42 = arith.constant 0 : index
      %c0_43 = arith.constant 0 : index
      %51 = vector.load %arg15[%c0_41, %c0_42, %c0_43] : memref<1x8x1xf32, #tpu.memory_space<vmem>>, vector<1x8x1xf32>
      tpu.vector_store %arg15[%c0_41, %c0_42, %c0_43], %31 {strides = array<i32>} : memref<1x8x1xf32, #tpu.memory_space<vmem>>, vector<1x8x1xf32>,
    } else {
    }
    %6 = arith.cmpi eq, %arg2, %arg1 : i32
    %7 = arith.extui %6 : i1 to i32
    %c0_i32_2 = arith.constant 0 : i32
    %8 = arith.cmpi ne, %7, %c0_i32_2 : i32
    scf.if %8 {
      %c0 = arith.constant 0 : index
      %c0_3 = arith.constant 0 : index
      %c0_4 = arith.constant 0 : index
      %9 = vector.load %arg17[%c0, %c0_3, %c0_4] : memref<1x8x128xf32, #tpu.memory_space<vmem>>, vector<1x8x128xf32>
      %c0_5 = arith.constant 0 : index
      %c0_6 = arith.constant 0 : index
      %c0_7 = arith.constant 0 : index
      %10 = vector.load %arg16[%c0_5, %c0_6, %c0_7] : memref<1x8x1xf32, #tpu.memory_space<vmem>>, vector<1x8x1xf32>
      %11 = tpu.reciprocal %10 {approx = true} : vector<1x8x1xf32> -> vector<1x8x1xf32>
      %12 = vector.broadcast %11 : vector<1x8x1xf32> to vector<1x8x128xf32>
      %13 = arith.mulf %9, %12 : vector<1x8x128xf32>
      %14 = vector.shape_cast %13 : vector<1x8x128xf32> to vector<8x128xf32>
      %15 = arith.truncf %14 : vector<8x128xf32> to vector<8x128xbf16>
      %c0_8 = arith.constant 0 : index
      %c0_9 = arith.constant 0 : index
      %16 = vector.load %arg11[%c0_8, %c0_9] : memref<128x32xbf16, #tpu.memory_space<vmem>>, vector<128x32xbf16>
      %cst = arith.constant dense<0.000000e+00> : vector<8x32xf32>
      %17 = tpu.matmul %15, %16, %cst {dimension_numbers = #tpu.dot_dimension_numbers<[1], [0], [0], [1], [0, 0, 1, 1], [], []>} : vector<8x128xbf16>, vector<128x32xbf16>, vector<8x32xf32> -> vector<8x32xf32>
      %c0_10 = arith.constant 0 : index
      %c0_11 = arith.constant 0 : index
      %18 = vector.load %arg12[%c0_10, %c0_11] : memref<1x32xf32, #tpu.memory_space<vmem>>, vector<1x32xf32>
      %19 = vector.broadcast %18 : vector<1x32xf32> to vector<8x32xf32>
      %20 = arith.addf %17, %19 : vector<8x32xf32>
      %21 = vector.shape_cast %20 : vector<8x32xf32> to vector<1x8x32xf32>
      %c0_12 = arith.constant 0 : index
      %c0_13 = arith.constant 0 : index
      %c0_14 = arith.constant 0 : index
      %22 = vector.load %arg13[%c0_12, %c0_13, %c0_14] : memref<1x8x32xf32, #tpu.memory_space<vmem>>, vector<1x8x32xf32>
      tpu.vector_store %arg13[%c0_12, %c0_13, %c0_14], %21 {strides = array<i32>} : memref<1x8x32xf32, #tpu.memory_space<vmem>>, vector<1x8x32xf32>,
    } else {
    }
    return
  }
  func.func @transform_0(%arg0: i32, %arg1: i32, %arg2: i32) -> (i32, i32, i32) {
    %c0_i32 = arith.constant 0 : i32
    %c0_i32_0 = arith.constant 0 : i32
    return %arg0, %arg1, %c0_i32 : i32, i32, i32
  }
  func.func @transform_1(%arg0: i32, %arg1: i32, %arg2: i32) -> (i32, i32, i32) {
    %0 = arith.minsi %arg2, %arg1 : i32
    %c0_i32 = arith.constant 0 : i32
    %c0_i32_0 = arith.constant 0 : i32
    return %arg0, %0, %c0_i32 : i32, i32, i32
  }
  func.func @transform_2(%arg0: i32, %arg1: i32, %arg2: i32) -> (i32, i32) {
    %c0_i32 = arith.constant 0 : i32
    %c0_i32_0 = arith.constant 0 : i32
    %c0_i32_1 = arith.constant 0 : i32
    return %c0_i32, %c0_i32_0 : i32, i32
  }
  func.func @transform_3(%arg0: i32, %arg1: i32, %arg2: i32) -> (i32, i32) {
    %c0_i32 = arith.constant 0 : i32
    %c0_i32_0 = arith.constant 0 : i32
    %c0_i32_1 = arith.constant 0 : i32
    return %c0_i32, %c0_i32_0 : i32, i32
  }
  func.func @transform_4(%arg0: i32, %arg1: i32, %arg2: i32) -> (i32, i32) {
    %c0_i32 = arith.constant 0 : i32
    %c0_i32_0 = arith.constant 0 : i32
    %c0_i32_1 = arith.constant 0 : i32
    return %c0_i32, %c0_i32_0 : i32, i32
  }
  func.func @transform_5(%arg0: i32, %arg1: i32, %arg2: i32) -> (i32, i32) {
    %c0_i32 = arith.constant 0 : i32
    %c0_i32_0 = arith.constant 0 : i32
    return %arg1, %c0_i32 : i32, i32
  }
  func.func @transform_6(%arg0: i32, %arg1: i32, %arg2: i32) -> (i32, i32) {
    %0 = arith.minsi %arg2, %arg1 : i32
    %c0_i32 = arith.constant 0 : i32
    %c0_i32_0 = arith.constant 0 : i32
    return %0, %c0_i32 : i32, i32
  }
  func.func @transform_7(%arg0: i32, %arg1: i32, %arg2: i32) -> (i32, i32, i32) {
    %0 = arith.cmpi sge, %arg2, %arg1 : i32
    %c1_i32 = arith.constant 1 : i32
    %c0_i32 = arith.constant 0 : i32
    %1 = arith.select %0, %c1_i32, %c0_i32 : i32
    %c0_i32_0 = arith.constant 0 : i32
    %c0_i32_1 = arith.constant 0 : i32
    %c0_i32_2 = arith.constant 0 : i32
    return %1, %c0_i32_0, %c0_i32_1 : i32, i32, i32
  }
  func.func @transform_8(%arg0: i32, %arg1: i32, %arg2: i32) -> (i32, i32) {
    %c0_i32 = arith.constant 0 : i32
    %c0_i32_0 = arith.constant 0 : i32
    %c0_i32_1 = arith.constant 0 : i32
    return %c0_i32, %c0_i32_0 : i32, i32
  }
  func.func @transform_9(%arg0: i32, %arg1: i32, %arg2: i32) -> (i32, i32) {
    %c0_i32 = arith.constant 0 : i32
    %c0_i32_0 = arith.constant 0 : i32
    %c0_i32_1 = arith.constant 0 : i32
    return %c0_i32, %c0_i32_0 : i32, i32
  }
  func.func @transform_10(%arg0: i32, %arg1: i32, %arg2: i32) -> (i32, i32, i32) {
    %c0_i32 = arith.constant 0 : i32
    %c0_i32_0 = arith.constant 0 : i32
    return %arg0, %arg1, %c0_i32 : i32, i32, i32
  }
}

</mosaic_0001>

<bundles_post_ra>
// kernel: tpu_custom_call.1
= control target key start
LH: loop header
LB: loop body
LE: loop exit
PB: predicated region body
PF: predicated region fallthrough
CT: control target
= control target key end

     0   :  { %15 = vsyncpa [#allocation7], 0  ;;  %s1729_s0 = inlined_call_operand.vmem [shape: bf16[2,8,32], index: 0, kind: input, shape index: {}]   ;;  %s1730_s1 = inlined_call_operand.vmem [shape: bf16[2,8,32], index: 1, kind: input, shape index: {}]   ;;  %s1731_s2 = inlined_call_operand.vmem [shape: bf16[32,128], index: 2, kind: input, shape index: {}]   ;;  %s1732_s3 = inlined_call_operand.vmem [shape: bf16[32,128], index: 3, kind: input, shape index: {}]   ;;  %s1733_s4 = inlined_call_operand.vmem [shape: bf16[32,128], index: 4, kind: input, shape index: {}]   ;;  %s1734_s5 = inlined_call_operand.vmem [shape: f32[8,128], index: 5, kind: input, shape index: {}]   ;;  %s1735_s6 = inlined_call_operand.hbm [shape: f32[8,128], index: 6, kind: input, shape index: {}]   ;;  %s1736_s7 = inlined_call_operand.vmem [shape: f32[2,8,8], index: 7, kind: input, shape index: {}]   ;;  %s1737_s8 = inlined_call_operand.vmem [shape: bf16[128,32], index: 8, kind: input, shape index: {}]   ;;  %s1738_s9 = inlined_call_operand.vmem [shape: f32[1,32], index: 9, kind: input, shape index: {}]   ;;  %s1739_s10 = inlined_call_operand.hbm [shape: f32[2,8,32], index: 10, kind: output, shape index: {}]  }
   0x1   :  { %16 = vsyncpa [#allocation8], 0 }
   0x2   :  { %18 = vsyncpa [#allocation8 + $0x1], 0  ;;  %s1485_s13 = smov 0   ;;  %s1487_s14 = smov 0  }
   0x3   :  { %s1489_s15 = smov 0   ;;  %s1491_s16 = smov 0  }
   0x4   :  { %s1493_s17 = smov 0   ;;  %s1495_s18 = smov 0  }
   0x5 LB: > { %1746 = sst [smem:[#allocation12_spill]] %s1418_s17  ;;  %s1106_s19 = sadd.s32 4294967295, %s1422_s18   ;;  %s1422_s18 = sphi %s1495_s18, %s24_s18   ;;  %s1418_s17 = sphi %s1493_s17, %s1758_s17   ;;  %s1414_s16 = sphi %s1491_s16, %s1757_s16   ;;  %s1410_s15 = sphi %s1489_s15, %s1761_s15   ;;  %s1406_s14 = sphi %s1487_s14, %s1760_s14   ;;  %s1402_s13 = sphi %s1485_s13, %s1759_s13  }
   0x6   : > { %s1107_s20 = sadd.s32 4294967294, %s1422_s18   ;;  %s43_s21 = sadd.s32 1, %s1418_s17 }
   0x7   : > { %s303_s22 = sadd.s32 1, %s1410_s15  ;;  %p45_p0 = scmp.ge.s32.totalorder %s43_s21, 2 }
   0x8   : > { %p313_p1 = scmp.ne.s32.totalorder %s1410_s15, %s1406_s14  ;;  %p314_p2 = scmp.eq.s32.totalorder %s1106_s19, 1 }
   0x9   : > { %p319_p3 = scmp.ne.s32.totalorder %s1406_s14, %s1402_s13  ;;  %s1763_s21 = smov (%p45_p0, %s43_s21), 0 }
   0xa   : > { %1747 = sst [smem:[#allocation13_spill]] %s1763_s21  ;;  %p1525_p4 = por %p314_p2, %p313_p1 }
   0xb   : > { %p320_p5 = scmp.eq.s32.totalorder %s1107_s20, 1  ;;  %s298_s24 = ssub.s32 %s1418_s17, %s1763_s21 }
   0xc   : > { %s1748_s23 = scalar_select %p1525_p4, 1, 0 }
   0xd   : > { %p1108_p6 = scmp.ge.s32.totalorder %s1422_s18, 1  ;;  %p301_p7 = scmp.eq.s32.totalorder %s298_s24, 0 }
   0xe   : > { %p1532_p8 = por %p320_p5, %p319_p3  ;;  %p327_p9 = scmp.lt.s32.totalorder %s1422_s18, 3 }
   0xf   : > { %s1538_s26 = scalar_select %p301_p7, %s1410_s15, %s303_s22  }
  0x10   : > { %s1749_s25 = scalar_select %p1532_p8, 1, 0 }
  0x11   : > { %p1540_p10 = pnand %p1108_p6, %p327_p9  ;;  %p1544_p11 = scmp.eq.s32.totalorder %s1106_s19, 0 }
  0x12   : > { %s1424_s29 = smov [#allocation6]   ;;  %s1312_s22 = scalar_lea.hbm %s1735_s6, 128 }
  0x13   : > { %s1750_s27 = scalar_select %p1540_p10, 1, 0 }
  0x14   : > { %s1751_s28 = scalar_select %p1544_p11, 1, 0 }
  0x15   : > { %p1226_p12 = pneg %p1540_p10  ;;  %s360_s30 = sshll.u32 %s1424_s29, 4  ;;  %s361_s30 = int_to_ptr.vmem [resolvable:$true] %s360_s30 }
  0x16   : > { %p1313_p0 = scmp.ne.s32.totalorder %s1735_s6, %s1312_s22  ;;  %p1319_p5 = scmp.lt.u32.totalorder %s1312_s22, %s1735_s6 }
  0x17   : > { %p1552_p13 = pnand %p1544_p11, %p1226_p12 }
  0x19   : > { %p1314_p1 = pneg %p1552_p13 }
  0x1b   : > { %p1315_p2 = pnand %p1314_p1, %p1313_p0 }
  0x1d   : > { %p1316_p3 = pneg %p1315_p2 }
  0x1f   : > { %p1321_p6 = pnand %p1319_p5, %p1316_p3 }
  0x21   : > { %1324 = shalt.err (!%p1321_p6)
}
  0x22   : > { %s1325_s17 = scalar_lea.vmem %s361_s30, 128  ;;  %p1333_p8 = scmp.lt.s32.totalorder %s361_s30, %s361_s30 }
  0x23   : > { %p1326_p7 = scmp.ne.s32.totalorder %s361_s30, %s1325_s17  ;;  %p1334_p4 = scmp.lt.s32.totalorder %s1325_s17, %s1325_s17 }
  0x25   : > { %p1328_p9 = pnand %p1326_p7, %p1314_p1  ;;  %p1335_p11 = por %p1334_p4, %p1333_p8 }
  0x27   : > { %p1329_p12 = pneg %p1328_p9 }
  0x29   : > { %p1336_p10 = pnand %p1335_p11, %p1329_p12 }
  0x2b   : > { %1339 = shalt.err (!%p1336_p10)
}
  0x2c   : > { %1229 = dma.hbm_to_vmem [thread:$0]  (!%p1552_p13), %s1735_s6, 128, %s361_s30, [#allocation7]  }
  0x2d   : > { %p1753_p0 = scmp.ne.s32.totalorder %s1750_s27, 0 }
  0x2e   : > { %p1754_p2 = scmp.ne.s32.totalorder (!%p1753_p0), %s1751_s28, 0 }
  0x2f   : > { %414 = sbr.rel (%p1753_p0) target bundleno = 1324 (0x52c), region = 60 }
  0x36   : > { %1393 = dma.done.wait (%p1754_p2), [#allocation7], 128  }
  0x37   : > { %1395 = vsyncadd (%p1754_p2), [#allocation7], 4294967168  ;;  %p473_p4 = scmp.lt.s32.totalorder %s1414_s16, 1  ;;  %v1425_v0 = vmov 0.0   ;;  %vm1426_vm0 = vmmov 0   ;;  %v1292_v1 = vld [vmem:[%s1731_s2] sm:$0xff]  }
  0x38   : > { %1164 = vmatprep.subr.bf16.mxu0 %v1425_v0  ;;  %1168 = vmatprep.mubr.msk.bf16.mxu0 %vm1426_vm0, %v1425_v0  ;;  %v1293_v2 = vld [vmem:[%s1731_s2 + $0x8] sm:$0xff]   ;;  %vm527_vm1 = vcmask 261120   ;;  %v1294_v4 = vld [vmem:[%s1732_s3] sm:$0xff]   ;;  %v644_v14 = vld [vmem:[#allocation6] sm:$0xff]  ;;  %vm575_vm2 = vcmask 7168   ;;  %v1427_v23 = vmov -inf  }
  0x39   : > { %s474_s17 = scalar_select %p473_p4, %s1414_s16, 1  ;;  %1188 = vmatprep.subr.bf16.mxu1 %v1425_v0  ;;  %1190 = vmatprep.mubr.msk.bf16.mxu1 %vm1426_vm0, %v1425_v0  ;;  %v1295_v5 = vld [vmem:[%s1732_s3 + $0x8] sm:$0xff]   ;;  %v571_v7 = vld [vmem:[%s1734_s5] sm:$0xff]  ;;  %576 = vst.msk [vmem:[#allocation3] sm:$0xff] %vm575_vm2, %v1427_v23  ;;  %577 = vst.msk [vmem:[#allocation4] sm:$0xff] %vm575_vm2, %v1425_v0  ;;  %vm749_vm3 = vcmask 64512  }
  0x3a   : > { %1165 = vmatpush3.bf16.msra.mxu0 %v1292_v1  ;;  %v1296_v22 = vld [vmem:[%s1733_s4] sm:$0xff]   ;;  %v1297_v24 = vld [vmem:[%s1733_s4 + $0x8] sm:$0xff]   ;;  %v1428_v33 = vmov 0   ;;  %vm784_vm4 = vcmask 1043456   ;;  %v1300_v54 = vld [vmem:[%s1737_s8 + $0x10] sm:$0xff]   ;;  %s470_s11 = sand.u32 1, %s1406_s14  }
  0x3b   : > { %s1116_s21 = sshll.u32 %s474_s17, 2  ;;  %1166 = vmatprep.subr.bf16.mxu0 %v1425_v0  ;;  %v1127_v26 = vld [vmem:[%s1736_s7 + $0x8] sm:$0xff]  ;;  %1290 = vset.pattern.permute.xlu0 %v1428_v33  ;;  %v1298_v52 = vld [vmem:[%s1737_s8] sm:$0xff]   ;;  %v1301_v55 = vld [vmem:[%s1737_s8 + $0x18] sm:$0xff]   ;;  %s1139_s24 = sshll.u32 %s1414_s16, 7 }
  0x3c   : > { %s479_s22 = scalar_lea.vmem %s1729_s0, %s1116_s21  ;;  %s488_s30 = scalar_lea.vmem %s1730_s1, %s1116_s21  ;;  %1291 = vset.pattern.permute.xlu1 %v1428_v33  ;;  %v1299_v53 = vld [vmem:[%s1737_s8 + $0x8] sm:$0xff]   ;;  %v1302_v56 = vld [vmem:[%s1737_s8 + $0x20] sm:$0xff]   ;;  %v1304_v58 = vld [vmem:[%s1737_s8 + $0x30] sm:$0xff]  }
  0x3d   : > { %v510_v3 = vld [vmem:[%s479_s22] sm:$0xf]  ;;  %v1303_v57 = vld [vmem:[%s1737_s8 + $0x28] sm:$0xff]   ;;  %s1115_s22 = sshll.u32 %s470_s11, 3  ;;  %s1681_s27 = scalar_lea.hbm %s1739_s10, %s1139_s24 }
  0x3e   : > { %1167 = vmatpush3.bf16.msra.mxu0 %v1293_v2  ;;  %v583_v6 = vld [vmem:[%s488_s30] sm:$0xf]  ;;  %v1305_v2 = vld [vmem:[%s1737_s8 + $0x38] sm:$0xff]   ;;  %s472_s29 = scalar_lea.vmem [#allocation9], %s1115_s22  ;;  %s959_s16 = scalar_lea.sflag [#allocation8], %s470_s11 }
  0x3f   : > { %1172 = vmatprep.subr.bf16.mxu0 %v1425_v0  ;;  %s973_s12 = sshll.u32 %s472_s29, 4  ;;  %p1755_p10 = scmp.ne.s32.totalorder %s1748_s23, 0  ;;  %s1683_s12 = int_to_ptr.vmem [resolvable:$true] %s973_s12 }
  0x40   : > { %v748_v34 = vld [vmem:[#allocation3] sm:$0xff]  ;;  %v765_v59 = vld [vmem:[#allocation4] sm:$0xff]  ;;  %s1340_s28 = scalar_lea.vmem %s1683_s12, 128  ;;  %s1429_s30 = smov [#allocation9]  }
  0x41   : > { %1169 = vmatmul.mubr.msk.bf16.vlgmr.msra.gmra.mrb[0].mxu0 %vm527_vm1, %v510_v3  ;;  %p1341_p8 = scmp.ne.s32.totalorder %s1683_s12, %s1340_s28  ;;  %s1344_s22 = sshll.u32 %s1429_s30, 4  ;;  %s1345_s22 = int_to_ptr.vmem [resolvable:$false] %s1344_s22 }
  0x42   : > { %1173 = vmatpush3.bf16.msra.mxu0 %v1294_v4  ;;  %1176 = vmatprep.mubr.msk.bf16.mxu0 %vm1426_vm0, %v1425_v0  ;;  %s1346_s21 = scalar_lea.vmem %s1345_s22, 256  ;;  %p1347_p1 = scmp.lt.s32.totalorder %s1683_s12, %s1345_s22 }
  0x43   : > { %1174 = vmatprep.subr.bf16.mxu0 %v1425_v0  ;;  %p1342_p11 = pnand %p1341_p8, %p1755_p10  ;;  %p1348_p3 = scmp.lt.s32.totalorder %s1346_s21, %s1340_s28 }
  0x45   : > { %p1343_p13 = pneg %p1342_p11  ;;  %p1349_p5 = por %p1348_p3, %p1347_p1 }
  0x46   : > { %1175 = vmatpush3.bf16.msra.mxu0 %v1295_v5 }
  0x47   : > { %1180 = vmatprep.subr.bf16.mxu0 %v1425_v0  ;;  %p1350_p6 = pnand %p1349_p5, %p1343_p13 }
  0x49   : > { %1177 = vmatmul.mubr.msk.bf16.vlgmr.msra.gmra.mrb[4].mxu0 %vm527_vm1, %v583_v6 }
  0x4a   : > { %1184 = vmatprep.mubr.msk.bf16.mxu0 %vm1426_vm0, %v1425_v0  ;;  %1181 = vmatpush3.bf16.msra.mxu0 %v1296_v22 }
  0x4b   : > { %1182 = vmatprep.subr.bf16.mxu0 %v1425_v0 }
  0x4e   : > { %1183 = vmatpush3.bf16.msra.mxu0 %v1297_v24 }
  0x4f   : > { %1194 = vmatprep.subr.bf16.mxu0 %v1425_v0 }
  0x51   : > { %1185 = vmatmul.mubr.msk.bf16.vlgmr.msra.gmra.mrb[8].mxu0 %vm527_vm1, %v583_v6 }
  0x52   : > { %1196 = vmatprep.mubr.msk.bf16.mxu0 %vm1426_vm0, %v1425_v0 }
 0x114   : > { %v565_v8 = vpop.f32.mrb[0].mxu0 }
 0x115   : > { %v572_v9 = vadd.f32 %v571_v7, %v565_v8  ;;  %v1170_v10 = vpop.f32.mrb[1].mxu0 }
 0x116   : > { %v568_v11 = vpop.f32.mrb[2].mxu0 }
 0x117   : > { %v573_v12 = vpack.c.bf16 %v572_v9, %v572_v9  ;;  %v1171_v13 = vpop.f32.mrb[3].mxu0 }
 0x119   : > { %574 = vst [vmem:[#allocation2] sm:$0xf] %v573_v12  ;;  %v1129_v12 = vld [vmem:[%s1738_s9] ss:$0 sm:$0xff] }
 0x11c   : > { %v638_v15 = vpop.f32.mrb[4].mxu0 }
 0x11d   : > { %v645_v16 = vadd.f32 %v644_v14, %v638_v15  ;;  %v1178_v17 = vpop.f32.mrb[5].mxu0 }
 0x11e   : > { %v641_v18 = vpop.f32.mrb[6].mxu0 }
 0x11f   : > { %v646_v19 = vpack.c.bf16 %v645_v16, %v645_v16  ;;  %v1179_v20 = vpop.f32.mrb[7].mxu0 }
 0x120   : > { %v704_v21 = vld [vmem:[#allocation2] sm:$0xf] }
 0x121   : > { %1189 = vmatpush3.bf16.xpose.msra.mxu1 %v646_v19 }
 0x122   : > { %1200 = vmatprep.subr.bf16.mxu1 %v1425_v0 }
 0x124   : > { %v697_v38 = vpop.f32.mrb[8].mxu0 }
 0x125   : > { %v703_v39 = vpack.c.bf16 %v697_v38, %v697_v38  ;;  %v1186_v40 = vpop.f32.mrb[9].mxu0 }
 0x126   : > { %v700_v41 = vpop.f32.mrb[10].mxu0 }
 0x127   : > { %v786_v42 = vsel %vm784_vm4, %v703_v39, 0  ;;  %v1187_v43 = vpop.f32.mrb[11].mxu0 }
 0x128   : > { %1191 = vmatmul.mubr.bf16.vlgmr.msra.gmra.mrb[0].mxu1 %v704_v21  ;;  %1195 = vmatpush3.bf16.msra.mxu0 %v786_v42 }
 0x129   : > { %1216 = vmatprep.mubr.msk.bf16.mxu1 %vm1426_vm0, %v1425_v0  ;;  %1201 = vmatpush3.bf16.msra.mxu1 %v1298_v52 }
 0x12a   : > { %1202 = vmatprep.subr.bf16.mxu1 %v1425_v0 }
 0x12d   : > { %1203 = vmatpush3.bf16.msra.mxu1 %v1299_v53 }
 0x12e   : > { %1204 = vmatprep.subr.bf16.mxu1 %v1425_v0 }
 0x131   : > { %1205 = vmatpush3.bf16.msra.mxu1 %v1300_v54 }
 0x132   : > { %1206 = vmatprep.subr.bf16.mxu1 %v1425_v0 }
 0x135   : > { %1207 = vmatpush3.bf16.msra.mxu1 %v1301_v55 }
 0x136   : > { %1208 = vmatprep.subr.bf16.mxu1 %v1425_v0 }
 0x139   : > { %1209 = vmatpush3.bf16.msra.mxu1 %v1302_v56 }
 0x13a   : > { %1210 = vmatprep.subr.bf16.mxu1 %v1425_v0 }
 0x13d   : > { %1211 = vmatpush3.bf16.msra.mxu1 %v1303_v57 }
 0x13e   : > { %1212 = vmatprep.subr.bf16.mxu1 %v1425_v0 }
 0x141   : > { %1213 = vmatpush3.bf16.msra.mxu1 %v1304_v58 }
 0x142   : > { %1214 = vmatprep.subr.bf16.mxu1 %v1425_v0 }
 0x145   : > { %1215 = vmatpush3.bf16.msra.mxu1 %v1305_v2 }
 0x1fb   : > { %v739_v25 = vpop.f32.mrb[0].mxu1 }
 0x1fc   : > { %v745_v27 = vmul.f32 0.17677669, %v739_v25  ;;  %v1192_v28 = vpop.f32.mrb[1].mxu1 }
 0x1fd   : > { %v742_v29 = vpop.f32.mrb[2].mxu1 }
 0x1fe   : > { %v1193_v30 = vpop.f32.mrb[3].mxu1  ;;  %v747_v31 = vadd.f32 %v1127_v26, %v745_v27 }
 0x200   : > { %v750_v32 = vsel %vm749_vm3, %v747_v31, -inf }
 0x201   : > { %751 = vmax.xlane.f32.xlu0 %v750_v32 }
 0x28e   : > { %v752_v35 = vpop.xlane.xlu0 %751 }
 0x28f   : > { %v753_v36 = vmax.f32 %v748_v34, %v752_v35 }
 0x291   : > { %v754_v37 = vsub.f32 %v748_v34, %v753_v36  ;;  %830 = vst.msk [vmem:[#allocation3] sm:$0xff] %vm575_vm2, %v753_v36  ;;  %759 = vperm.xlu0 %1290, %v753_v36  }
 0x293   : > { %v755_v50 = vmul.f32 1.442695, %v754_v37 }
 0x310   : > { %v760_v44 = vpop.permute.xlu0 %759 }
 0x311   : > { %v762_v45 = vsub.f32 %v747_v31, %v760_v44 }
 0x313   : > { %v763_v46 = vmul.f32 1.442695, %v762_v45 }
 0x315   : > { %1306 = vpow2.f32 %v763_v46 }
 0x316   : > { %1308 = vpow2.f32 %v755_v50 }
 0x31f   : > { %v1307_v47 = vpop.eup %1306 }
 0x320   : > { %v767_v48 = vsel %vm749_vm3, %v1307_v47, 0.0  ;;  %v780_v49 = vpack.c.bf16 %v1307_v47, %v1307_v47  ;;  %v1309_v51 = vpop.eup %1308 }
 0x321   : > { %768 = vadd.xlane.f32.xlu1 %v767_v48  ;;  %v766_v60 = vmul.f32 %v1309_v51, %v765_v59 }
 0x322   : > { %1197 = vmatmul.mubr.msk.bf16.vlgmr.msra.gmra.mrb[12].mxu0 %vm749_vm3, %v780_v49 }
 0x332   : > { %776 = vperm.xlu1 %1291, %v1309_v51  }
 0x3ae   : > { %v769_v61 = vpop.xlane.xlu1 %768 }
 0x3af   : > { %v770_v62 = vadd.f32 %v769_v61, %v766_v60 }
 0x3b1   : > { %772 = vst.msk [vmem:[#allocation4] sm:$0xff] %vm575_vm2, %v770_v62 }
 0x3b2   : > { %v777_v6 = vpop.permute.xlu1 %776 }
 0x3b3   : > { %v779_v7 = vmul.f32 0.0, %v777_v6 }
 0x3b8   : > { %v836_v63 = vld [vmem:[#allocation4] sm:$0xff] }
 0x3b9   : > { %1310 = vrcp.f32 %v836_v63 }
 0x3c3   : > { %v1311_v1 = vpop.eup %1310 }
 0x3c4   : > { %840 = vperm.xlu1 %1291, %v1311_v1  }
 0x3f5   : > { %v822_v3 = vpop.f32.mrb[12].mxu0 }
 0x3f6   : > { %v1198_v4 = vpop.f32.mrb[13].mxu0  ;;  %v828_v8 = vadd.f32 %v822_v3, %v779_v7 }
 0x3f7   : > { %v825_v0 = vpop.f32.mrb[14].mxu0 }
 0x3f8   : > { %v1199_v5 = vpop.f32.mrb[15].mxu0 }
 0x443   : > { %v841_v9 = vpop.permute.xlu1 %840 }
 0x444   : > { %v843_v10 = vmul.f32 %v841_v9, %v828_v8 }
 0x446   : > { %v844_v11 = vpack.c.bf16 %v843_v10, %v843_v10 }
 0x448   : > { %1217 = vmatmul.mubr.bf16.vlgmr.msra.gmra.mrb[4].mxu1 %v844_v11 }
 0x51b   : > { %v950_v13 = vpop.f32.mrb[4].mxu1 }
 0x51c   : > { %v951_v14 = vadd.f32 %v1129_v12, %v950_v13  ;;  %v1218_v15 = vpop.f32.mrb[5].mxu1 }
 0x51d   : > { %v953_v16 = vpop.f32.mrb[6].mxu1 }
 0x51e   : > { %v1219_v17 = vpop.f32.mrb[7].mxu1  ;;  %957 = vst.msk [vmem:[%s472_s29] sm:$0xff] %vm527_vm1, %v951_v14 }
 0x51f   : > { %1353 = shalt.err (!%p1350_p6)
}
 0x520   : > { %s1354_s11 = scalar_lea.hbm %s1681_s27, 128  ;;  %s1358_s29 = scalar_lea.hbm %s1739_s10, 256 }
 0x521   : > { %p1355_p7 = scmp.ne.s32.totalorder %s1681_s27, %s1354_s11  ;;  %p1359_p0 = scmp.lt.u32.totalorder %s1681_s27, %s1739_s10 }
 0x522   : > { %p1360_p2 = scmp.lt.u32.totalorder %s1358_s29, %s1354_s11  ;;  %p1362_p8 = scmp.lt.u32.totalorder %s1354_s11, %s1681_s27 }
 0x523   : > { %p1356_p9 = pnand %p1355_p7, %p1755_p10 }
 0x524   : > { %p1361_p4 = por %p1360_p2, %p1359_p0 }
 0x525   : > { %p1357_p12 = pneg %p1356_p9 }
 0x526   : > { %p1363_p11 = por %p1362_p8, %p1361_p4 }
 0x528   : > { %p1364_p13 = pnand %p1363_p11, %p1357_p12 }
 0x52a   : > { %1367 = shalt.err (!%p1364_p13)
}
 0x52b   : > { %1224 = dma.vmem_to_hbm [thread:$0]  (%p1755_p10), %s1683_s12, 128, %s1681_s27, %s959_s16  }
 0x52c PF: > { %p1236_p1 = scmp.ge.s32.totalorder %s1422_s18, 2  ;;  %s985_s28 = sand.u32 1, %s1402_s13  }
 0x52d   : > { %p1756_p3 = scmp.ne.s32.totalorder %s1749_s25, 0  ;;  %s986_s30 = scalar_lea.sflag [#allocation8], %s985_s28 }
 0x52f   : > { %p1231_p5 = pnand %p1236_p1, %p1756_p3 }
 0x531   : > { %1397 = dma.done.wait (!%p1231_p5), %s986_s30, 128  }
 0x532   : > { %1399 = vsyncadd (!%p1231_p5), %s986_s30, 4294967168  ;;  %s24_s18 = sadd.s32 1, %s1422_s18   ;;  %s1757_s16 = sld [smem:[#allocation12_spill]] }
 0x533   : > { %p21_p6 = scmp.ge.s32.totalorder %s24_s18, 4   ;;  %s1758_s17 = sld [smem:[#allocation13_spill]] }
 0x534   : > { %s1759_s13 = smov %s1406_s14  ;;  %s1760_s14 = smov %s1410_s15 }
 0x535   : > { %s1761_s15 = smov %s1538_s26  ;;  %23 = sbr.rel (!%p21_p6) target bundleno = 5 (0x5), region = 122 }
 0x53c   :  { %991 = vsyncpa [#allocation7], 1 }
 0x53d   :  { %993 = vsyncpa [#allocation7 + $0x1], 1 }
 0x53e   :  { %994 = vsyncpa [#allocation8], 1 }
 0x53f   :  { %996 = vsyncpa [#allocation8 + $0x1], 1 }

</bundles_post_ra>
